<compile_context>
chip_gen: v7x
topology: tpu7x:2x2x1
jax: 0.10.0
libtpu: 0.0.40
codegen_flags: <defaults>
</compile_context>

<pallas_src>
import jax
import jax.numpy as jnp
from jax import lax
from jax.experimental import pallas as pl
from jax.experimental.pallas import tpu as pltpu


def _global_aggr_kernel(h_full_ref, h_tile_ref, w_ref, out_ref, k_ref):
    """One grid step processes one tile of attention *columns* (query rows).

    h_full_ref : (N, Din)   bf16  all node features (resident; key projection)
    h_tile_ref : (tj, Din)  bf16  node features of this column tile (query/gate)
    w_ref      : (Din, 3H)  bf16  fused weights laid out as [wq | wg | wk]
    out_ref    : (N, H)     f32   output accumulator (same block every step)
    k_ref      : (N, H)     bf16  VMEM scratch: key projection, computed once
    """
    j = pl.program_id(0)
    H = out_ref.shape[1]

    @pl.when(j == 0)
    def _():
        # One-time work: key projection for ALL nodes + zero the accumulator.
        k_ref[...] = jnp.dot(
            h_full_ref[...], w_ref[:, 2 * H:],
            preferred_element_type=jnp.float32).astype(k_ref.dtype)
        out_ref[...] = jnp.zeros_like(out_ref)

    # Fused [query|gate] projection for this column tile: ONE 2H-wide MXU matmul.
    qg = jnp.dot(h_tile_ref[...], w_ref[:, : 2 * H],
                 preferred_element_type=jnp.float32)                 # (tj, 2H) f32
    q_tile = qg[:, :H]                                               # (tj, H)
    v_tile = qg[:, H:]                                               # (tj, H) = h_tile @ wg

    # logits[:, tile] = key @ query_tile^T, expressed as a contraction over the
    # hidden axis of BOTH operands -> no materialized transpose / XLU relayout.
    logits = lax.dot_general(
        k_ref[...], q_tile.astype(k_ref.dtype),
        dimension_numbers=(((1,), (1,)), ((), ())),
        preferred_element_type=jnp.float32)                          # (N, tj) f32

    # Column-wise (dim=0) softmax is EXACT within the tile: all N rows are present.
    m = jnp.max(logits, axis=0, keepdims=True)                       # (1, tj)
    p = jnp.exp(logits - m)                                          # (N, tj)  EUP
    denom = jnp.sum(p, axis=0, keepdims=True)                        # (1, tj)
    # Exact reciprocal + multiply instead of N*tj f32 divides (divide is multi-op on
    # the VPU).  approx=True would be cheaper still but its ~2^-12 rel. error eats
    # into the tolerance budget, so keep it exact.
    inv = pl.reciprocal(denom)                                       # (1, tj)
    p_norm = p * inv                                                 # (N, tj)

    # Accumulate this tile's contribution: out += softmax(logits)[:, tile] @ (h_tile @ wg).
    out_ref[...] += jnp.dot(p_norm.astype(jnp.bfloat16),
                            v_tile.astype(jnp.bfloat16),
                            preferred_element_type=jnp.float32)


def _choose_col_tile(n, logits_budget_bytes=6 << 20):
    """Largest column tile whose (N, tj) f32 logits fit the per-step budget."""
    if n * n * 4 <= logits_budget_bytes:
        return n
    tj = (logits_budget_bytes // (n * 4)) // 128 * 128
    tj = max(128, min(tj, n))
    while tj > 128 and n % tj:
        tj -= 128
    return tj


def global_aggr_forward(h, wq, wk, wg):
    """h: (N, 1, inp_dim) node features; returns (N, 1, hid_dim)."""
    assert h.ndim == 3 and h.shape[1] == 1, "expected g.ndata['h'] of shape (N, 1, inp_dim)"
    N, Din = h.shape[0], h.shape[2]
    H = wq.shape[1]
    assert wq.shape == (Din, H) and wk.shape == (Din, H) and wg.shape == (Din, H)

    h2 = h.reshape(N, Din)                                           # squeeze(1)

    # Fused weight [wq | wg | wk]: per-tile matmul uses the contiguous [:, :2H] slab,
    # the one-time key projection uses [:, 2H:].
    w_fused = jnp.concatenate([wq, wg, wk], axis=1)

    # bf16 MXU operands (f32 accumulation inside the kernel); halves input DMA bytes.
    h_bf = h2.astype(jnp.bfloat16)
    w_bf = w_fused.astype(jnp.bfloat16)

    tj = _choose_col_tile(N)
    assert N % tj == 0, f"N={N} must be divisible by column tile tj={tj}"
    J = N // tj

    # Explicit scoped-VMEM limit (v5e's default is only 16 MiB); stays well under
    # v7x's 64 MiB physical VMEM for the budgeted tile sizes.
    bytes_inputs = 2 * (N * Din * 2 + tj * Din * 2 + Din * 3 * H * 2)  # double-buffered bf16
    bytes_out = 2 * N * H * 4
    bytes_scratch = N * H * 2
    bytes_work = 4 * N * tj * 4                                        # logits/p temporaries
    vmem_limit = min(64 << 20,
                     max(int(1.5 * (bytes_inputs + bytes_out + bytes_scratch + bytes_work)),
                         16 << 20))

    # Advisory cost hint: key proj + per-tile q|g proj + logits + aggregation, N*N exps.
    flops = 2 * N * Din * 3 * H + 4 * N * N * H
    bytes_accessed = 2 * (2 * N * Din + Din * 3 * H) + 4 * N * H
    cost = pl.CostEstimate(flops=flops, transcendentals=N * N,
                           bytes_accessed=bytes_accessed)

    out = pl.pallas_call(
        _global_aggr_kernel,
        out_shape=jax.ShapeDtypeStruct((N, H), jnp.float32),
        grid_spec=pltpu.PrefetchScalarGridSpec(
            num_scalar_prefetch=0,
            grid=(J,),
            in_specs=[
                pl.BlockSpec((N, Din), lambda j: (0, 0)),        # h full (key), resident
                pl.BlockSpec((tj, Din), lambda j: (j, 0)),       # h column tile (query/gate)
                pl.BlockSpec((Din, 3 * H), lambda j: (0, 0)),    # fused weights, resident
            ],
            out_specs=pl.BlockSpec((N, H), lambda j: (0, 0)),    # accumulator across j
            scratch_shapes=[pltpu.VMEM((N, H), jnp.bfloat16)],   # key projection
        ),
        compiler_params=pltpu.CompilerParams(
            dimension_semantics=("arbitrary",),                  # output accumulates over j
            vmem_limit_bytes=vmem_limit,
        ),
        cost_estimate=cost,
    )(h_bf, h_bf, w_bf)

    return out[:, None, :]                                       # unsqueeze(1)


def reference_forward(h, wq, wk, wg):
    """Pure-JAX f32 reference reproducing the PyTorch GlobalAggr forward."""
    h2 = h.reshape(h.shape[0], h.shape[2]).astype(jnp.float32)
    q = h2 @ wq
    k = h2 @ wk
    attn = k @ q.T
    attn = jax.nn.softmax(attn, axis=0)        # nn.Softmax(dim=0)
    out = attn @ (h2 @ wg)
    return out[:, None, :]


if __name__ == "__main__":
    # Lane/sublane-dense small shapes: N, inp_dim, hid_dim multiples of (8, 128).
    N, INP_DIM, HID_DIM = 128, 128, 128

    key = jax.random.PRNGKey(0)
    k_h, k_wq, k_wk, k_wg = jax.random.split(key, 4)

    # xavier_uniform_ with relu gain: bound = gain * sqrt(6 / (fan_in + fan_out))
    gain = float(jnp.sqrt(2.0))
    bound = gain * (6.0 / (INP_DIM + HID_DIM)) ** 0.5
    wq = jax.random.uniform(k_wq, (INP_DIM, HID_DIM), minval=-bound, maxval=bound,
                            dtype=jnp.float32)
    wk = jax.random.uniform(k_wk, (INP_DIM, HID_DIM), minval=-bound, maxval=bound,
                            dtype=jnp.float32)
    wg = jax.random.uniform(k_wg, (INP_DIM, HID_DIM), minval=-bound, maxval=bound,
                            dtype=jnp.float32)

    # g.ndata['h'] has shape (N, 1, inp_dim); mild scale keeps the softmax well-conditioned.
    h = jax.random.normal(k_h, (N, 1, INP_DIM), dtype=jnp.float32) * 0.1

    out = jax.block_until_ready(global_aggr_forward(h, wq, wk, wg))
    ref = reference_forward(h, wq, wk, wg)

    assert out.shape == (N, 1, HID_DIM)
    # bf16 MXU operands with f32 accumulation: expected error ~1e-4..1e-3 vs f32 ref.
    assert jnp.allclose(out, ref, atol=1e-2, rtol=1e-2)

    print("KERNEL_OK")
</pallas_src>

<mosaic_0001>
module attributes {stable_mosaic.version = 11 : i64} {
  func.func @_global_aggr_kernel(%arg0: i32, %arg1: memref<128x128xbf16, #tpu.memory_space<vmem>>, %arg2: memref<128x128xbf16, #tpu.memory_space<vmem>>, %arg3: memref<128x384xbf16, #tpu.memory_space<vmem>>, %arg4: memref<128x128xf32, #tpu.memory_space<vmem>>, %arg5: memref<128x128xbf16, #tpu.memory_space<vmem>>) attributes {dimension_semantics = [#tpu.dimension_semantics<arbitrary>], iteration_bounds = array<i64: 1>, scalar_prefetch = 0 : i64, scratch_operands = 1 : i64, tpu.core_type = #tpu.core_type<tc>, window_params = [{pipeline_mode = #tpu.pipeline_mode<synchronous>, transform_indices = @transform_0, window_bounds = array<i64: 128, 128>}, {transform_indices = @transform_1, window_bounds = array<i64: 128, 128>}, {pipeline_mode = #tpu.pipeline_mode<synchronous>, transform_indices = @transform_2, window_bounds = array<i64: 128, 384>}, {pipeline_mode = #tpu.pipeline_mode<synchronous>, transform_indices = @transform_3, window_bounds = array<i64: 128, 128>}]} {
    %c0_i32 = arith.constant 0 : i32
    %0 = arith.cmpi eq, %arg0, %c0_i32 : i32
    %1 = arith.extui %0 : i1 to i32
    %c0_i32_0 = arith.constant 0 : i32
    %2 = arith.cmpi ne, %1, %c0_i32_0 : i32
    scf.if %2 {
      %c0_14 = arith.constant 0 : index
      %c0_15 = arith.constant 0 : index
      %27 = vector.load %arg1[%c0_14, %c0_15] : memref<128x128xbf16, #tpu.memory_space<vmem>>, vector<128x128xbf16>
      %c0_16 = arith.constant 0 : index
      %c256 = arith.constant 256 : index
      %28 = vector.load %arg3[%c0_16, %c256] : memref<128x384xbf16, #tpu.memory_space<vmem>>, vector<128x128xbf16>
      %cst_17 = arith.constant dense<0.000000e+00> : vector<128x128xf32>
      %29 = tpu.matmul %27, %28, %cst_17 {dimension_numbers = #tpu.dot_dimension_numbers<[1], [0], [0], [1], [0, 0, 1, 1], [], []>} : vector<128x128xbf16>, vector<128x128xbf16>, vector<128x128xf32> -> vector<128x128xf32>
      %30 = arith.truncf %29 : vector<128x128xf32> to vector<128x128xbf16>
      %c0_18 = arith.constant 0 : index
      %c0_19 = arith.constant 0 : index
      %31 = vector.load %arg5[%c0_18, %c0_19] : memref<128x128xbf16, #tpu.memory_space<vmem>>, vector<128x128xbf16>
      tpu.vector_store %arg5[%c0_18, %c0_19], %30 {strides = array<i32>} : memref<128x128xbf16, #tpu.memory_space<vmem>>, vector<128x128xbf16>,
      %cst_20 = arith.constant 0.000000e+00 : f32
      %32 = vector.broadcast %cst_20 : f32 to vector<128x128xf32>
      %c0_21 = arith.constant 0 : index
      %c0_22 = arith.constant 0 : index
      %33 = vector.load %arg4[%c0_21, %c0_22] : memref<128x128xf32, #tpu.memory_space<vmem>>, vector<128x128xf32>
      tpu.vector_store %arg4[%c0_21, %c0_22], %32 {strides = array<i32>} : memref<128x128xf32, #tpu.memory_space<vmem>>, vector<128x128xf32>,
    } else {
    }
    %c0 = arith.constant 0 : index
    %c0_1 = arith.constant 0 : index
    %3 = vector.load %arg2[%c0, %c0_1] : memref<128x128xbf16, #tpu.memory_space<vmem>>, vector<128x128xbf16>
    %c0_2 = arith.constant 0 : index
    %c0_3 = arith.constant 0 : index
    %4 = vector.load %arg3[%c0_2, %c0_3] : memref<128x384xbf16, #tpu.memory_space<vmem>>, vector<128x256xbf16>
    %cst = arith.constant dense<0.000000e+00> : vector<128x256xf32>
    %5 = tpu.matmul %3, %4, %cst {dimension_numbers = #tpu.dot_dimension_numbers<[1], [0], [0], [1], [0, 0, 1, 1], [], []>} : vector<128x128xbf16>, vector<128x256xbf16>, vector<128x256xf32> -> vector<128x256xf32>
    %6 = vector.extract_strided_slice %5 {offsets = [0, 0], sizes = [128, 128], strides = [1, 1]} : vector<128x256xf32> to vector<128x128xf32>
    %7 = vector.extract_strided_slice %5 {offsets = [0, 128], sizes = [128, 128], strides = [1, 1]} : vector<128x256xf32> to vector<128x128xf32>
    %c0_4 = arith.constant 0 : index
    %c0_5 = arith.constant 0 : index
    %8 = vector.load %arg5[%c0_4, %c0_5] : memref<128x128xbf16, #tpu.memory_space<vmem>>, vector<128x128xbf16>
    %9 = arith.truncf %6 : vector<128x128xf32> to vector<128x128xbf16>
    %cst_6 = arith.constant dense<0.000000e+00> : vector<128x128xf32>
    %10 = tpu.matmul %8, %9, %cst_6 {dimension_numbers = #tpu.dot_dimension_numbers<[1], [1], [0], [0], [0, 0, 1, 0], [], []>} : vector<128x128xbf16>, vector<128x128xbf16>, vector<128x128xf32> -> vector<128x128xf32>
    %cst_7 = arith.constant dense<0xFF800000> : vector<128xf32>
    %11 = vector.multi_reduction <maximumf>, %10, %cst_7 [0] : vector<128x128xf32> to vector<128xf32>
    %12 = vector.shape_cast %11 : vector<128xf32> to vector<1x128xf32>
    %13 = vector.broadcast %12 : vector<1x128xf32> to vector<128x128xf32>
    %14 = arith.subf %10, %13 : vector<128x128xf32>
    %15 = math.exp %14 : vector<128x128xf32>
    %cst_8 = arith.constant dense<0.000000e+00> : vector<128xf32>
    %16 = vector.multi_reduction <add>, %15, %cst_8 [0] : vector<128x128xf32> to vector<128xf32>
    %17 = vector.shape_cast %16 : vector<128xf32> to vector<1x128xf32>
    %18 = tpu.reciprocal %17 : vector<1x128xf32> -> vector<1x128xf32>
    %19 = vector.broadcast %18 : vector<1x128xf32> to vector<128x128xf32>
    %20 = arith.mulf %15, %19 : vector<128x128xf32>
    %c0_9 = arith.constant 0 : index
    %c0_10 = arith.constant 0 : index
    %21 = vector.load %arg4[%c0_9, %c0_10] : memref<128x128xf32, #tpu.memory_space<vmem>>, vector<128x128xf32>
    %22 = arith.truncf %20 : vector<128x128xf32> to vector<128x128xbf16>
    %23 = arith.truncf %7 : vector<128x128xf32> to vector<128x128xbf16>
    %cst_11 = arith.constant dense<0.000000e+00> : vector<128x128xf32>
    %24 = tpu.matmul %22, %23, %cst_11 {dimension_numbers = #tpu.dot_dimension_numbers<[1], [0], [0], [1], [0, 0, 1, 1], [], []>} : vector<128x128xbf16>, vector<128x128xbf16>, vector<128x128xf32> -> vector<128x128xf32>
    %25 = arith.addf %21, %24 : vector<128x128xf32>
    %c0_12 = arith.constant 0 : index
    %c0_13 = arith.constant 0 : index
    %26 = vector.load %arg4[%c0_12, %c0_13] : memref<128x128xf32, #tpu.memory_space<vmem>>, vector<128x128xf32>
    tpu.vector_store %arg4[%c0_12, %c0_13], %25 {strides = array<i32>} : memref<128x128xf32, #tpu.memory_space<vmem>>, vector<128x128xf32>,
    return
  }
  func.func @transform_0(%arg0: i32) -> (i32, i32) {
    %c0_i32 = arith.constant 0 : i32
    %c0_i32_0 = arith.constant 0 : i32
    %c0_i32_1 = arith.constant 0 : i32
    return %c0_i32, %c0_i32_0 : i32, i32
  }
  func.func @transform_1(%arg0: i32) -> (i32, i32) {
    %c0_i32 = arith.constant 0 : i32
    %c0_i32_0 = arith.constant 0 : i32
    return %arg0, %c0_i32 : i32, i32
  }
  func.func @transform_2(%arg0: i32) -> (i32, i32) {
    %c0_i32 = arith.constant 0 : i32
    %c0_i32_0 = arith.constant 0 : i32
    %c0_i32_1 = arith.constant 0 : i32
    return %c0_i32, %c0_i32_0 : i32, i32
  }
  func.func @transform_3(%arg0: i32) -> (i32, i32) {
    %c0_i32 = arith.constant 0 : i32
    %c0_i32_0 = arith.constant 0 : i32
    %c0_i32_1 = arith.constant 0 : i32
    return %c0_i32, %c0_i32_0 : i32, i32
  }
}

</mosaic_0001>

<bundles_post_ra>
// kernel: tpu_custom_call.1
= control target key start
LH: loop header
LB: loop body
LE: loop exit
PB: predicated region body
PF: predicated region fallthrough
CT: control target
= control target key end

     0   :  { %8 = vsyncpa [#allocation4], 0  ;;  %s1501_s0 = inlined_call_operand.hbm [shape: bf16[128,128], index: 0, kind: input, shape index: {}]   ;;  %s1502_s1 = inlined_call_operand.hbm [shape: bf16[128,128], index: 1, kind: input, shape index: {}]   ;;  %s1503_s2 = inlined_call_operand.hbm [shape: bf16[128,384], index: 2, kind: input, shape index: {}]   ;;  %s1504_s3 = inlined_call_operand.hbm [shape: f32[128,128], index: 3, kind: output, shape index: {}]  }
   0x1   :  { %9 = vsyncpa [#allocation7], 0 }
   0x2   :  { %10 = vsyncpa [#allocation5], 0  ;;  %s1362_s12 = smov [#allocation6]   ;;  %s1363_s14 = smov [#allocation3]  }
   0x3   :  { %s28_s13 = sshll.u32 %s1362_s12, 4  ;;  %s16_s15 = sshll.u32 %s1363_s14, 4  ;;  %s29_s13 = int_to_ptr.vmem [resolvable:$true] %s28_s13  ;;  %s1393_s15 = int_to_ptr.vmem [resolvable:$true] %s16_s15 }
   0x4   :  { %s1268_s18 = scalar_lea.hbm %s1502_s1, 1024 }
   0x5   :  { %p1269_p0 = scmp.ne.s32.totalorder %s1502_s1, %s1268_s18  ;;  %p1272_p1 = scmp.lt.u32.totalorder %s1268_s18, %s1502_s1 }
   0x7   :  { %p1274_p2 = pnand %p1272_p1, %p1269_p0 }
   0x9   :  { %1277 = shalt.err (!%p1274_p2)
}
   0xa   :  { %s1278_s23 = scalar_lea.vmem %s29_s13, 1024  ;;  %p1283_p4 = scmp.lt.s32.totalorder %s29_s13, %s29_s13 }
   0xb   :  { %p1279_p3 = scmp.ne.s32.totalorder %s29_s13, %s1278_s23  ;;  %p1284_p5 = scmp.lt.s32.totalorder %s1278_s23, %s1278_s23 }
   0xd   :  { %p1285_p6 = por %p1284_p5, %p1283_p4 }
   0xf   :  { %p1286_p7 = pnand %p1285_p6, %p1279_p3 }
  0x11   :  { %1289 = shalt.err (!%p1286_p7)
}
  0x12   :  { %s1364_s24 = smov 64   ;;  %s1365_s25 = smov 4  }
  0x13   :  { %34 = dma.hbm_to_vmem [thread:$0]  %s1502_s1, 1024, %s29_s13, [#allocation7], %s1364_s24, %s1364_s24, %s1365_s25  }
  0x14   :  { %s1290_s30 = scalar_lea.hbm %s1501_s0, 1024 }
  0x15   :  { %p1291_p8 = scmp.ne.s32.totalorder %s1501_s0, %s1290_s30  ;;  %p1294_p9 = scmp.lt.u32.totalorder %s1290_s30, %s1501_s0 }
  0x17   :  { %p1296_p10 = pnand %p1294_p9, %p1291_p8 }
  0x19   :  { %1299 = shalt.err (!%p1296_p10)
}
  0x1a   :  { %s1300_s8 = scalar_lea.vmem %s1393_s15, 1024  ;;  %p1305_p12 = scmp.lt.s32.totalorder %s1393_s15, %s1393_s15 }
  0x1b   :  { %p1301_p11 = scmp.ne.s32.totalorder %s1393_s15, %s1300_s8  ;;  %p1306_p13 = scmp.lt.s32.totalorder %s1300_s8, %s1300_s8 }
  0x1d   :  { %p1307_p0 = por %p1306_p13, %p1305_p12 }
  0x1f   :  { %p1308_p1 = pnand %p1307_p0, %p1301_p11 }
  0x21   :  { %1311 = shalt.err (!%p1308_p1)
}
  0x22   :  { %22 = dma.hbm_to_vmem [thread:$0]  %s1501_s0, 1024, %s1393_s15, [#allocation4], %s1364_s24, %s1364_s24, %s1365_s25  }
  0x23   :  { %s1366_s10 = smov [#allocation8]   ;;  %s1312_s14 = scalar_lea.hbm %s1503_s2, 3072 }
  0x24   :  { %s40_s11 = sshll.u32 %s1366_s10, 4  ;;  %p1313_p2 = scmp.ne.s32.totalorder %s1503_s2, %s1312_s14  ;;  %s41_s11 = int_to_ptr.vmem [resolvable:$true] %s40_s11 }
  0x25   :  { %p1316_p3 = scmp.lt.u32.totalorder %s1312_s14, %s1503_s2 }
  0x27   :  { %p1318_p4 = pnand %p1316_p3, %p1313_p2 }
  0x29   :  { %1321 = shalt.err (!%p1318_p4)
}
  0x2a   :  { %s1322_s20 = scalar_lea.vmem %s41_s11, 3072  ;;  %p1327_p6 = scmp.lt.s32.totalorder %s41_s11, %s41_s11 }
  0x2b   :  { %p1323_p5 = scmp.ne.s32.totalorder %s41_s11, %s1322_s20  ;;  %p1328_p7 = scmp.lt.s32.totalorder %s1322_s20, %s1322_s20 }
  0x2d   :  { %p1329_p8 = por %p1328_p7, %p1327_p6 }
  0x2f   :  { %p1330_p9 = pnand %p1329_p8, %p1323_p5 }
  0x31   :  { %1333 = shalt.err (!%p1330_p9)
}
  0x32   :  { %s1367_s0 = smov 192   ;;  %s1368_s15 = smov 12  }
  0x33   :  { %46 = dma.hbm_to_vmem [thread:$0]  %s1503_s2, 3072, %s41_s11, [#allocation7], %s1367_s0, %s1367_s0, %s1368_s15  }
  0x34   :  { %1356 = dma.done.wait [#allocation4], 1024  }
  0x35   :  { %1357 = vsyncadd [#allocation4], 4294966272 }
  0x36   :  { %1358 = dma.done.wait [#allocation7], 4096  }
  0x37   :  { %1359 = vsyncadd [#allocation7], 4294963200  ;;  %v1369_v0 = vmov 0   ;;  %v1186_v1 = vld [vmem:[#allocation8 + $0x4] ss:$12 sps:$4 sm:$0xff]   ;;  %v1211_v26 = vld [vmem:[#allocation6 + $0x8] sm:$0xff]  }
  0x38   :  { %510 = vmatprep.mubr.bf16.mxu1 %v1369_v0  ;;  %v1188_v2 = vld [vmem:[#allocation8] ss:$12 sps:$4 sm:$0xff]   ;;  %478 = vmatprep.subr.bf16.mxu1 %v1186_v1  ;;  %v1189_v3 = vld [vmem:[#allocation8 + $0x1c] ss:$12 sps:$4 sm:$0xff]   ;;  %v1191_v4 = vld [vmem:[#allocation8 + $0x18] ss:$12 sps:$4 sm:$0xff]  }
  0x39   :  { %479 = vmatpush1.bf16.msra.mxu1 %v1188_v2  ;;  %v1192_v5 = vld [vmem:[#allocation8 + $0x34] ss:$12 sps:$4 sm:$0xff]   ;;  %v1194_v6 = vld [vmem:[#allocation8 + $0x30] ss:$12 sps:$4 sm:$0xff]   ;;  %v1195_v7 = vld [vmem:[#allocation8 + $0x4c] ss:$12 sps:$4 sm:$0xff]  }
  0x3a   :  { %480 = vmatprep.subr.bf16.mxu1 %v1189_v3  ;;  %v1197_v8 = vld [vmem:[#allocation8 + $0x48] ss:$12 sps:$4 sm:$0xff]   ;;  %v1198_v9 = vld [vmem:[#allocation8 + $0x64] ss:$12 sps:$4 sm:$0xff]   ;;  %v1200_v10 = vld [vmem:[#allocation8 + $0x60] ss:$12 sps:$4 sm:$0xff]  }
  0x3b   :  { %v1201_v11 = vld [vmem:[#allocation8 + $0x7c] ss:$12 sps:$4 sm:$0xff]   ;;  %v1215_v13 = vld [vmem:[#allocation8 + $0x20] ss:$12 sps:$4 sm:$0xff]   ;;  %v1203_v14 = vld [vmem:[#allocation8 + $0x78] ss:$12 sps:$4 sm:$0xff]  }
  0x3c   :  { %v1214_v12 = vld [vmem:[#allocation8 + $0x8] ss:$12 sps:$4 sm:$0xff]   ;;  %v1217_v15 = vld [vmem:[#allocation8 + $0x38] ss:$12 sps:$4 sm:$0xff]   ;;  %v1206_v17 = vld [vmem:[#allocation8 + $0x90] ss:$12 sps:$4 sm:$0xff]  }
  0x3d   :  { %481 = vmatpush1.bf16.msra.mxu1 %v1191_v4  ;;  %1078 = vmatprep.subr.bf16.mxu0 %v1214_v12  ;;  %v1204_v16 = vld [vmem:[#allocation8 + $0x94] ss:$12 sps:$4 sm:$0xff]   ;;  %v1218_v18 = vld [vmem:[#allocation8 + $0x50] ss:$12 sps:$4 sm:$0xff]   ;;  %v1207_v19 = vld [vmem:[#allocation8 + $0xac] ss:$12 sps:$4 sm:$0xff]  }
  0x3e   :  { %482 = vmatprep.subr.bf16.mxu1 %v1192_v5  ;;  %1079 = vmatpush3.bf16.msra.mxu0 %v1214_v12  ;;  %v1209_v20 = vld [vmem:[#allocation8 + $0xa8] ss:$12 sps:$4 sm:$0xff]   ;;  %v1226_v22 = vld [vmem:[#allocation3] sm:$0xff]   ;;  %v1224_v27 = vld [vmem:[#allocation8 + $0xb0] ss:$12 sps:$4 sm:$0xff]   ;;  %s1370_s2 = smov [#allocation9]  }
  0x3f   :  { %1080 = vmatprep.subr.bf16.mxu0 %v1215_v13  ;;  %v1220_v21 = vld [vmem:[#allocation8 + $0x68] ss:$12 sps:$4 sm:$0xff]   ;;  %1094 = vmatprep.mubr.bf16.mxu0 %v1226_v22  ;;  %v1210_v23 = vld [vmem:[#allocation6] sm:$0xff]   ;;  %v1229_v31 = vld [vmem:[#allocation3 + $0x18] sm:$0xff]   ;;  %s977_s23 = sshll.u32 %s1370_s2, 4  ;;  %s978_s23 = int_to_ptr.vmem [resolvable:$true] %s977_s23 }
  0x40   :  { %v1221_v24 = vld [vmem:[#allocation8 + $0x80] ss:$12 sps:$4 sm:$0xff]   ;;  %v1223_v25 = vld [vmem:[#allocation8 + $0x98] ss:$12 sps:$4 sm:$0xff]   ;;  %v1212_v29 = vld [vmem:[#allocation6 + $0x10] sm:$0xff]   ;;  %s1334_s24 = scalar_lea.vmem %s978_s23, 2048  ;;  %p1339_p11 = scmp.lt.s32.totalorder %s978_s23, %s978_s23 }
  0x41   :  { %483 = vmatpush1.bf16.msra.mxu1 %v1194_v6  ;;  %v1227_v28 = vld [vmem:[#allocation3 + $0x8] sm:$0xff]   ;;  %v1228_v30 = vld [vmem:[#allocation3 + $0x10] sm:$0xff]   ;;  %v1213_v32 = vld [vmem:[#allocation6 + $0x18] sm:$0xff]   ;;  %p1335_p10 = scmp.ne.s32.totalorder %s978_s23, %s1334_s24  ;;  %p1340_p12 = scmp.lt.s32.totalorder %s1334_s24, %s1334_s24 }
  0x42   :  { %484 = vmatprep.subr.bf16.mxu1 %v1195_v7  ;;  %1081 = vmatpush3.bf16.msra.mxu0 %v1215_v13  ;;  %v1230_v33 = vld [vmem:[#allocation3 + $0x20] sm:$0xff]   ;;  %v1231_v34 = vld [vmem:[#allocation3 + $0x28] sm:$0xff]   ;;  %v1232_v36 = vld [vmem:[#allocation3 + $0x30] sm:$0xff]  }
  0x43   :  { %1082 = vmatprep.subr.bf16.mxu0 %v1217_v15  ;;  %v1216_v35 = vld [vmem:[#allocation6 + $0x20] sm:$0xff]   ;;  %v1233_v37 = vld [vmem:[#allocation3 + $0x38] sm:$0xff]   ;;  %v1219_v38 = vld [vmem:[#allocation6 + $0x28] sm:$0xff]   ;;  %p1341_p13 = por %p1340_p12, %p1339_p11 }
  0x44   :  { %v1222_v39 = vld [vmem:[#allocation6 + $0x30] sm:$0xff]   ;;  %v1225_v40 = vld [vmem:[#allocation6 + $0x38] sm:$0xff]  }
  0x45   :  { %485 = vmatpush1.bf16.msra.mxu1 %v1197_v8  ;;  %p1342_p0 = pnand %p1341_p13, %p1335_p10 }
  0x46   :  { %486 = vmatprep.subr.bf16.mxu1 %v1198_v9  ;;  %1083 = vmatpush3.bf16.msra.mxu0 %v1217_v15 }
  0x47   :  { %1084 = vmatprep.subr.bf16.mxu0 %v1218_v18 }
  0x49   :  { %487 = vmatpush1.bf16.msra.mxu1 %v1200_v10 }
  0x4a   :  { %488 = vmatprep.subr.bf16.mxu1 %v1201_v11  ;;  %1085 = vmatpush3.bf16.msra.mxu0 %v1218_v18 }
  0x4b   :  { %1086 = vmatprep.subr.bf16.mxu0 %v1220_v21 }
  0x4d   :  { %489 = vmatpush1.bf16.msra.mxu1 %v1203_v14 }
  0x4e   :  { %490 = vmatprep.subr.bf16.mxu1 %v1204_v16  ;;  %1087 = vmatpush3.bf16.msra.mxu0 %v1220_v21 }
  0x4f   :  { %1088 = vmatprep.subr.bf16.mxu0 %v1221_v24 }
  0x51   :  { %491 = vmatpush1.bf16.msra.mxu1 %v1206_v17 }
  0x52   :  { %492 = vmatprep.subr.bf16.mxu1 %v1207_v19  ;;  %1089 = vmatpush3.bf16.msra.mxu0 %v1221_v24 }
  0x53   :  { %1090 = vmatprep.subr.bf16.mxu0 %v1223_v25 }
  0x55   :  { %493 = vmatpush1.bf16.msra.mxu1 %v1209_v20 }
  0x56   :  { %1091 = vmatpush3.bf16.msra.mxu0 %v1223_v25 }
  0x57   :  { %1092 = vmatprep.subr.bf16.mxu0 %v1224_v27 }
  0x58   :  { %511 = vmatmul.mubr.bf16.vlgmr.msra.gmra.mrb[0].mxu1 %v1210_v23 }
  0x59   :  { %520 = vmatprep.mubr.bf16.mxu1 %v1369_v0 }
  0x5a   :  { %1093 = vmatpush3.bf16.msra.mxu0 %v1224_v27 }
  0x5d   :  { %1095 = vmatmul.mubr.bf16.vlgmr.msra.gmra.mrb[0].mxu0 %v1227_v28 }
  0x5e   :  { %1098 = vmatprep.mubr.bf16.mxu0 %v1228_v30 }
  0x60   :  { %521 = vmatmul.mubr.bf16.gmra.mrb[4].mxu1 %v1211_v26 }
  0x61   :  { %530 = vmatprep.mubr.bf16.mxu1 %v1369_v0 }
  0x65   :  { %1099 = vmatmul.mubr.bf16.gmra.mrb[4].mxu0 %v1229_v31 }
  0x66   :  { %1102 = vmatprep.mubr.bf16.mxu0 %v1230_v33 }
  0x68   :  { %531 = vmatmul.mubr.bf16.gmra.mrb[8].mxu1 %v1212_v29 }
  0x69   :  { %540 = vmatprep.mubr.bf16.mxu1 %v1369_v0 }
  0x6d   :  { %1103 = vmatmul.mubr.bf16.gmra.mrb[8].mxu0 %v1231_v34 }
  0x6e   :  { %1106 = vmatprep.mubr.bf16.mxu0 %v1232_v36 }
  0x70   :  { %541 = vmatmul.mubr.bf16.gmra.mrb[12].mxu1 %v1213_v32 }
  0x71   :  { %550 = vmatprep.mubr.bf16.mxu1 %v1369_v0 }
  0x75   :  { %1107 = vmatmul.mubr.bf16.gmra.mrb[12].mxu0 %v1233_v37 }
  0x78   :  { %551 = vmatmul.mubr.bf16.gmra.mrb[16].mxu1 %v1216_v35 }
  0x79   :  { %560 = vmatprep.mubr.bf16.mxu1 %v1369_v0 }
  0x80   :  { %561 = vmatmul.mubr.bf16.gmra.mrb[20].mxu1 %v1219_v38 }
  0x81   :  { %570 = vmatprep.mubr.bf16.mxu1 %v1369_v0 }
  0x88   :  { %571 = vmatmul.mubr.bf16.gmra.mrb[24].mxu1 %v1222_v39 }
  0x89   :  { %580 = vmatprep.mubr.bf16.mxu1 %v1369_v0 }
  0x90   :  { %581 = vmatmul.mubr.bf16.gmra.mrb[28].mxu1 %v1225_v40 }
 0x12b   :  { %v512_v41 = vpop.f32.mrb[0].mxu1 }
 0x12c   :  { %v514_v42 = vpop.f32.mrb[1].mxu1 }
 0x12d   :  { %v516_v43 = vpop.f32.mrb[2].mxu1 }
 0x12e   :  { %v599_v44 = vpack.c.bf16 %v516_v43, %v512_v41  ;;  %v518_v45 = vpop.f32.mrb[3].mxu1 }
 0x12f   :  { %v835_v46 = vpack.c.bf16 %v518_v45, %v514_v42 }
 0x130   :  { %1110 = vmatprep.subr.bf16.mxu0 %v599_v44  ;;  %v1444_v53 = vpop.f32.mrb[0].mxu0 }
 0x131   :  { %1111 = vmatpush3.bf16.xpose.msra.mxu0 %v599_v44  ;;  %1142 = vmatprep.subr.bf16.mxu1 %v835_v46  ;;  %v223_v55 = vpop.f32.mrb[1].mxu0 }
 0x132   :  { %1143 = vmatpush3.bf16.msra.mxu1 %v835_v46  ;;  %v1446_v57 = vpop.f32.mrb[2].mxu0 }
 0x133   :  { %v522_v47 = vpop.f32.mrb[4].mxu1  ;;  %v287_v59 = vpack.c.bf16 %v1446_v57, %v1444_v53  ;;  %v226_v60 = vpop.f32.mrb[3].mxu0 }
 0x134   :  { %v524_v48 = vpop.f32.mrb[5].mxu1  ;;  %v286_v63 = vpack.c.bf16 %v226_v60, %v223_v55 }
 0x135   :  { %v526_v49 = vpop.f32.mrb[6].mxu1 }
 0x136   :  { %v600_v50 = vpack.c.bf16 %v526_v49, %v522_v47  ;;  %v528_v51 = vpop.f32.mrb[7].mxu1  ;;  %1126 = vmatprep.mubr.bf16.mxu0 %v286_v63 }
 0x137   :  { %v836_v52 = vpack.c.bf16 %v528_v51, %v524_v48 }
 0x138   :  { %1112 = vmatprep.subr.bf16.mxu0 %v600_v50  ;;  %v1450_v1 = vpop.f32.mrb[4].mxu0 }
 0x139   :  { %1113 = vmatpush3.bf16.xpose.msra.mxu0 %v600_v50  ;;  %1144 = vmatprep.subr.bf16.mxu1 %v836_v52  ;;  %v1452_v3 = vpop.f32.mrb[5].mxu0 }
 0x13a   :  { %1145 = vmatpush3.bf16.msra.mxu1 %v836_v52  ;;  %v1454_v5 = vpop.f32.mrb[6].mxu0 }
 0x13b   :  { %v532_v54 = vpop.f32.mrb[8].mxu1  ;;  %v289_v7 = vpack.c.bf16 %v1454_v5, %v1450_v1  ;;  %v242_v8 = vpop.f32.mrb[7].mxu0 }
 0x13c   :  { %v534_v56 = vpop.f32.mrb[9].mxu1  ;;  %v288_v11 = vpack.c.bf16 %v242_v8, %v1452_v3 }
 0x13d   :  { %v536_v58 = vpop.f32.mrb[10].mxu1 }
 0x13e   :  { %v601_v61 = vpack.c.bf16 %v536_v58, %v532_v54  ;;  %v538_v62 = vpop.f32.mrb[11].mxu1 }
 0x13f   :  { %v837_v0 = vpack.c.bf16 %v538_v62, %v534_v56 }
 0x140   :  { %1114 = vmatprep.subr.bf16.mxu0 %v601_v61  ;;  %v1104_v13 = vpop.f32.mrb[8].mxu0 }
 0x141   :  { %1115 = vmatpush3.bf16.xpose.msra.mxu0 %v601_v61  ;;  %1146 = vmatprep.subr.bf16.mxu1 %v837_v0  ;;  %v255_v15 = vpop.f32.mrb[9].mxu0 }
 0x142   :  { %1147 = vmatpush3.bf16.msra.mxu1 %v837_v0  ;;  %v1105_v17 = vpop.f32.mrb[10].mxu0 }
 0x143   :  { %v542_v2 = vpop.f32.mrb[12].mxu1  ;;  %v291_v19 = vpack.c.bf16 %v1105_v17, %v1104_v13  ;;  %v258_v20 = vpop.f32.mrb[11].mxu0 }
 0x144   :  { %v544_v4 = vpop.f32.mrb[13].mxu1  ;;  %v290_v23 = vpack.c.bf16 %v258_v20, %v255_v15 }
 0x145   :  { %v546_v6 = vpop.f32.mrb[14].mxu1 }
 0x146   :  { %v602_v9 = vpack.c.bf16 %v546_v6, %v542_v2  ;;  %v548_v10 = vpop.f32.mrb[15].mxu1 }
 0x147   :  { %v838_v12 = vpack.c.bf16 %v548_v10, %v544_v4 }
 0x148   :  { %1116 = vmatprep.subr.bf16.mxu0 %v602_v9  ;;  %v1108_v25 = vpop.f32.mrb[12].mxu0 }
 0x149   :  { %1117 = vmatpush3.bf16.xpose.msra.mxu0 %v602_v9  ;;  %1148 = vmatprep.subr.bf16.mxu1 %v838_v12  ;;  %v271_v27 = vpop.f32.mrb[13].mxu0 }
 0x14a   :  { %1149 = vmatpush3.bf16.msra.mxu1 %v838_v12  ;;  %v1109_v29 = vpop.f32.mrb[14].mxu0 }
 0x14b   :  { %v552_v14 = vpop.f32.mrb[16].mxu1  ;;  %v293_v31 = vpack.c.bf16 %v1109_v29, %v1108_v25  ;;  %v274_v32 = vpop.f32.mrb[15].mxu0 }
 0x14c   :  { %v554_v16 = vpop.f32.mrb[17].mxu1  ;;  %v292_v35 = vpack.c.bf16 %v274_v32, %v271_v27 }
 0x14d   :  { %v556_v18 = vpop.f32.mrb[18].mxu1 }
 0x14e   :  { %v603_v21 = vpack.c.bf16 %v556_v18, %v552_v14  ;;  %v558_v22 = vpop.f32.mrb[19].mxu1 }
 0x14f   :  { %v839_v24 = vpack.c.bf16 %v558_v22, %v554_v16 }
 0x150   :  { %1118 = vmatprep.subr.bf16.mxu0 %v603_v21 }
 0x151   :  { %1119 = vmatpush3.bf16.xpose.msra.mxu0 %v603_v21  ;;  %1150 = vmatprep.subr.bf16.mxu1 %v839_v24 }
 0x152   :  { %1151 = vmatpush3.bf16.msra.mxu1 %v839_v24 }
 0x153   :  { %v562_v26 = vpop.f32.mrb[20].mxu1 }
 0x154   :  { %v564_v28 = vpop.f32.mrb[21].mxu1 }
 0x155   :  { %v566_v30 = vpop.f32.mrb[22].mxu1 }
 0x156   :  { %v604_v33 = vpack.c.bf16 %v566_v30, %v562_v26  ;;  %v568_v34 = vpop.f32.mrb[23].mxu1 }
 0x157   :  { %v840_v36 = vpack.c.bf16 %v568_v34, %v564_v28 }
 0x158   :  { %1120 = vmatprep.subr.bf16.mxu0 %v604_v33 }
 0x159   :  { %1121 = vmatpush3.bf16.xpose.msra.mxu0 %v604_v33  ;;  %1152 = vmatprep.subr.bf16.mxu1 %v840_v36 }
 0x15a   :  { %1153 = vmatpush3.bf16.msra.mxu1 %v840_v36 }
 0x15b   :  { %v572_v37 = vpop.f32.mrb[24].mxu1 }
 0x15c   :  { %v574_v38 = vpop.f32.mrb[25].mxu1 }
 0x15d   :  { %v576_v39 = vpop.f32.mrb[26].mxu1 }
 0x15e   :  { %v605_v40 = vpack.c.bf16 %v576_v39, %v572_v37  ;;  %v578_v41 = vpop.f32.mrb[27].mxu1 }
 0x15f   :  { %v841_v42 = vpack.c.bf16 %v578_v41, %v574_v38 }
 0x160   :  { %1122 = vmatprep.subr.bf16.mxu0 %v605_v40 }
 0x161   :  { %1123 = vmatpush3.bf16.xpose.msra.mxu0 %v605_v40  ;;  %1154 = vmatprep.subr.bf16.mxu1 %v841_v42 }
 0x162   :  { %1155 = vmatpush3.bf16.msra.mxu1 %v841_v42 }
 0x163   :  { %v582_v43 = vpop.f32.mrb[28].mxu1 }
 0x164   :  { %v584_v44 = vpop.f32.mrb[29].mxu1 }
 0x165   :  { %v586_v45 = vpop.f32.mrb[30].mxu1 }
 0x166   :  { %v606_v46 = vpack.c.bf16 %v586_v45, %v582_v43  ;;  %v588_v47 = vpop.f32.mrb[31].mxu1 }
 0x167   :  { %v842_v48 = vpack.c.bf16 %v588_v47, %v584_v44 }
 0x168   :  { %1124 = vmatprep.subr.bf16.mxu0 %v606_v46 }
 0x169   :  { %1125 = vmatpush3.bf16.xpose.msra.mxu0 %v606_v46  ;;  %1156 = vmatprep.subr.bf16.mxu1 %v842_v48 }
 0x16a   :  { %1157 = vmatpush3.bf16.msra.mxu1 %v842_v48 }
 0x170   :  { %1127 = vmatmul.mubr.bf16.vlgmr.msra.gmra.mrb[16].mxu0 %v287_v59 }
 0x171   :  { %1130 = vmatprep.mubr.bf16.mxu0 %v288_v11 }
 0x178   :  { %1131 = vmatmul.mubr.bf16.gmra.mrb[20].mxu0 %v289_v7 }
 0x179   :  { %1134 = vmatprep.mubr.bf16.mxu0 %v290_v23 }
 0x180   :  { %1135 = vmatmul.mubr.bf16.gmra.mrb[24].mxu0 %v291_v19 }
 0x181   :  { %1138 = vmatprep.mubr.bf16.mxu0 %v292_v35 }
 0x188   :  { %1139 = vmatmul.mubr.bf16.gmra.mrb[28].mxu0 %v293_v31 }
 0x243   :  { %v1128_v49 = vpop.f32.mrb[16].mxu0 }
 0x244   :  { %v641_v50 = vpop.f32.mrb[17].mxu0 }
 0x245   :  { %v1129_v51 = vpop.f32.mrb[18].mxu0 }
 0x246   :  { %v644_v52 = vpop.f32.mrb[19].mxu0 }
 0x24b   :  { %v1132_v54 = vpop.f32.mrb[20].mxu0 }
 0x24c   :  { %v706_v55 = vmax.f32 %v1128_v49, %v1132_v54  ;;  %v657_v56 = vpop.f32.mrb[21].mxu0 }
 0x24d   :  { %v704_v58 = vmax.f32 %v641_v50, %v657_v56  ;;  %v1133_v60 = vpop.f32.mrb[22].mxu0 }
 0x24e   :  { %v707_v53 = vmax.f32 %v1129_v51, %v1133_v60  ;;  %v660_v57 = vpop.f32.mrb[23].mxu0 }
 0x24f   :  { %v705_v59 = vmax.f32 %v644_v52, %v660_v57 }
 0x253   :  { %v1465_v61 = vpop.f32.mrb[24].mxu0 }
 0x254   :  { %v710_v62 = vmax.f32 %v706_v55, %v1465_v61  ;;  %v673_v63 = vpop.f32.mrb[25].mxu0 }
 0x255   :  { %v708_v0 = vmax.f32 %v704_v58, %v673_v63  ;;  %v1468_v1 = vpop.f32.mrb[26].mxu0 }
 0x256   :  { %v711_v2 = vmax.f32 %v707_v53, %v1468_v1  ;;  %v676_v3 = vpop.f32.mrb[27].mxu0 }
 0x257   :  { %v709_v4 = vmax.f32 %v705_v59, %v676_v3 }
 0x25b   :  { %v1471_v5 = vpop.f32.mrb[28].mxu0 }
 0x25c   :  { %v714_v6 = vmax.f32 %v710_v62, %v1471_v5  ;;  %v1474_v7 = vpop.f32.mrb[29].mxu0 }
 0x25d   :  { %v712_v8 = vmax.f32 %v708_v0, %v1474_v7  ;;  %v1477_v9 = vpop.f32.mrb[30].mxu0 }
 0x25e   :  { %v715_v10 = vmax.f32 %v711_v2, %v1477_v9  ;;  %v1480_v11 = vpop.f32.mrb[31].mxu0 }
 0x25f   :  { %v713_v12 = vmax.f32 %v709_v4, %v1480_v11 }
 0x260   :  { %v717_v13 = vmax.f32 %v714_v6, %v715_v10 }
 0x261   :  { %v716_v14 = vmax.f32 %v712_v8, %v713_v12 }
 0x263   :  { %v718_v15 = vmax.f32 %v716_v14, %v717_v13 }
 0x265   :  { %v719_v16 = vrot.slane %v718_v15, 4 }
 0x267   :  { %v720_v17 = vmax.f32 %v718_v15, %v719_v16 }
 0x269   :  { %v721_v18 = vrot.slane %v720_v17, 2 }
 0x26b   :  { %v722_v19 = vmax.f32 %v720_v17, %v721_v18 }
 0x26d   :  { %v723_v20 = vrot.slane %v722_v19, 1 }
 0x26f   :  { %v724_v21 = vmax.f32 %v722_v19, %v723_v20 }
 0x271   :  { %v725_v22 = vsub.f32 %v641_v50, %v724_v21  ;;  %v726_v23 = vsub.f32 %v644_v52, %v724_v21  ;;  %v727_v24 = vsub.f32 %v1128_v49, %v724_v21  ;;  %v728_v25 = vsub.f32 %v1129_v51, %v724_v21 }
 0x272   :  { %v729_v26 = vsub.f32 %v657_v56, %v724_v21  ;;  %v730_v27 = vsub.f32 %v660_v57, %v724_v21  ;;  %v731_v28 = vsub.f32 %v1132_v54, %v724_v21  ;;  %v732_v29 = vsub.f32 %v1133_v60, %v724_v21 }
 0x273   :  { %v733_v30 = vsub.f32 %v673_v63, %v724_v21  ;;  %v734_v31 = vsub.f32 %v676_v3, %v724_v21  ;;  %v735_v32 = vsub.f32 %v1465_v61, %v724_v21  ;;  %v736_v33 = vsub.f32 %v1468_v1, %v724_v21 }
 0x274   :  { %v737_v34 = vsub.f32 %v1474_v7, %v724_v21  ;;  %v738_v35 = vsub.f32 %v1480_v11, %v724_v21  ;;  %v739_v36 = vsub.f32 %v1471_v5, %v724_v21  ;;  %v740_v37 = vsub.f32 %v1477_v9, %v724_v21 }
 0x275   :  { %v741_v38 = vmul.f32 1.442695, %v725_v22  ;;  %v743_v39 = vmul.f32 1.442695, %v726_v23  ;;  %v745_v40 = vmul.f32 1.442695, %v727_v24 }
 0x276   :  { %v747_v41 = vmul.f32 1.442695, %v728_v25  ;;  %v749_v42 = vmul.f32 1.442695, %v729_v26  ;;  %v751_v43 = vmul.f32 1.442695, %v730_v27 }
 0x277   :  { %1234 = vpow2.f32 %v741_v38  ;;  %v753_v44 = vmul.f32 1.442695, %v731_v28  ;;  %v755_v45 = vmul.f32 1.442695, %v732_v29  ;;  %v757_v48 = vmul.f32 1.442695, %v733_v30 }
 0x278   :  { %1236 = vpow2.f32 %v743_v39  ;;  %v759_v51 = vmul.f32 1.442695, %v734_v31  ;;  %v761_v55 = vmul.f32 1.442695, %v735_v32  ;;  %v763_v60 = vmul.f32 1.442695, %v736_v33 }
 0x279   :  { %1238 = vpow2.f32 %v745_v40  ;;  %v765_v59 = vmul.f32 1.442695, %v737_v34  ;;  %v767_v63 = vmul.f32 1.442695, %v738_v35  ;;  %v769_v2 = vmul.f32 1.442695, %v739_v36 }
 0x27a   :  { %1240 = vpow2.f32 %v747_v41  ;;  %v771_v5 = vmul.f32 1.442695, %v740_v37 }
 0x27b   :  { %1242 = vpow2.f32 %v749_v42 }
 0x27c   :  { %1244 = vpow2.f32 %v751_v43 }
 0x27d   :  { %1246 = vpow2.f32 %v753_v44 }
 0x27e   :  { %1248 = vpow2.f32 %v755_v45 }
 0x27f   :  { %1250 = vpow2.f32 %v757_v48 }
 0x280   :  { %1252 = vpow2.f32 %v759_v51 }
 0x281   :  { %v1235_v46 = vpop.eup %1234  ;;  %1254 = vpow2.f32 %v761_v55 }
 0x282   :  { %v1237_v47 = vpop.eup %1236  ;;  %1256 = vpow2.f32 %v763_v60 }
 0x283   :  { %v773_v49 = vadd.f32 %v1237_v47, %v1235_v46  ;;  %v1239_v50 = vpop.eup %1238  ;;  %1258 = vpow2.f32 %v765_v59 }
 0x284   :  { %v1241_v54 = vpop.eup %1240  ;;  %1260 = vpow2.f32 %v767_v63 }
 0x285   :  { %v774_v52 = vadd.f32 %v1239_v50, %v773_v49  ;;  %v1243_v58 = vpop.eup %1242  ;;  %1262 = vpow2.f32 %v769_v2 }
 0x286   :  { %v1245_v57 = vpop.eup %1244  ;;  %1264 = vpow2.f32 %v771_v5 }
 0x287   :  { %v775_v56 = vadd.f32 %v1241_v54, %v774_v52  ;;  %v1247_v62 = vpop.eup %1246 }
 0x288   :  { %v1249_v1 = vpop.eup %1248 }
 0x289   :  { %v776_v53 = vadd.f32 %v1243_v58, %v775_v56  ;;  %v1251_v4 = vpop.eup %1250 }
 0x28a   :  { %v1253_v7 = vpop.eup %1252 }
 0x28b   :  { %v777_v61 = vadd.f32 %v1245_v57, %v776_v53  ;;  %v1255_v9 = vpop.eup %1254 }
 0x28c   :  { %v1257_v11 = vpop.eup %1256 }
 0x28d   :  { %v778_v0 = vadd.f32 %v1247_v62, %v777_v61  ;;  %v1259_v13 = vpop.eup %1258 }
 0x28e   :  { %v1261_v15 = vpop.eup %1260 }
 0x28f   :  { %v779_v3 = vadd.f32 %v1249_v1, %v778_v0  ;;  %v1263_v17 = vpop.eup %1262 }
 0x290   :  { %v1265_v19 = vpop.eup %1264 }
 0x291   :  { %v780_v6 = vadd.f32 %v1251_v4, %v779_v3 }
 0x293   :  { %v781_v8 = vadd.f32 %v1253_v7, %v780_v6 }
 0x295   :  { %v782_v10 = vadd.f32 %v1255_v9, %v781_v8 }
 0x297   :  { %v783_v12 = vadd.f32 %v1257_v11, %v782_v10 }
 0x299   :  { %v784_v14 = vadd.f32 %v1259_v13, %v783_v12 }
 0x29b   :  { %v785_v16 = vadd.f32 %v1261_v15, %v784_v14 }
 0x29d   :  { %v786_v18 = vadd.f32 %v1263_v17, %v785_v16 }
 0x29f   :  { %v787_v20 = vadd.f32 %v1265_v19, %v786_v18 }
 0x2a1   :  { %v788_v21 = vrot.slane %v787_v20, 4 }
 0x2a3   :  { %v789_v22 = vadd.f32 %v788_v21, %v787_v20 }
 0x2a5   :  { %v790_v23 = vrot.slane %v789_v22, 2 }
 0x2a7   :  { %v791_v24 = vadd.f32 %v790_v23, %v789_v22 }
 0x2a9   :  { %v792_v25 = vrot.slane %v791_v24, 1 }
 0x2ab   :  { %v793_v26 = vadd.f32 %v792_v25, %v791_v24 }
 0x2ad   :  { %1266 = vrcp.f32 %v793_v26 }
 0x2b7   :  { %v1267_v27 = vpop.eup %1266 }
 0x2b8   :  { %v795_v28 = vmul.f32 %v1267_v27, %v1235_v46  ;;  %v796_v29 = vmul.f32 %v1267_v27, %v1237_v47  ;;  %v797_v30 = vmul.f32 %v1267_v27, %v1239_v50  ;;  %v798_v31 = vmul.f32 %v1267_v27, %v1241_v54 }
 0x2b9   :  { %v799_v32 = vmul.f32 %v1267_v27, %v1243_v58  ;;  %v800_v33 = vmul.f32 %v1267_v27, %v1245_v57  ;;  %v801_v34 = vmul.f32 %v1267_v27, %v1247_v62  ;;  %v802_v35 = vmul.f32 %v1267_v27, %v1249_v1 }
 0x2ba   :  { %v827_v36 = vpack.c.bf16 %v796_v29, %v795_v28  ;;  %v828_v37 = vpack.c.bf16 %v798_v31, %v797_v30  ;;  %v803_v38 = vmul.f32 %v1267_v27, %v1251_v4  ;;  %v804_v39 = vmul.f32 %v1267_v27, %v1253_v7 }
 0x2bb   :  { %v829_v40 = vpack.c.bf16 %v800_v33, %v799_v32  ;;  %v830_v41 = vpack.c.bf16 %v802_v35, %v801_v34  ;;  %v805_v42 = vmul.f32 %v1267_v27, %v1255_v9  ;;  %v806_v43 = vmul.f32 %v1267_v27, %v1257_v11 }
 0x2bc   :  { %1158 = vmatprep.mubr.bf16.mxu1 %v827_v36  ;;  %v831_v44 = vpack.c.bf16 %v804_v39, %v803_v38  ;;  %v807_v45 = vmul.f32 %v1267_v27, %v1259_v13  ;;  %v808_v48 = vmul.f32 %v1267_v27, %v1261_v15  ;;  %v809_v46 = vmul.f32 %v1267_v27, %v1263_v17 }
 0x2bd   :  { %1159 = vmatmul.mubr.bf16.vlgmr.msra.gmra.mrb[32].mxu1 %v828_v37  ;;  %v832_v47 = vpack.c.bf16 %v806_v43, %v805_v42  ;;  %v810_v49 = vmul.f32 %v1267_v27, %v1265_v19 }
 0x2be   :  { %1162 = vmatprep.mubr.bf16.mxu1 %v829_v40  ;;  %v833_v50 = vpack.c.bf16 %v808_v48, %v807_v45 }
 0x2bf   :  { %v834_v51 = vpack.c.bf16 %v810_v49, %v809_v46 }
 0x2c5   :  { %1163 = vmatmul.mubr.bf16.gmra.mrb[36].mxu1 %v830_v41 }
 0x2c6   :  { %1166 = vmatprep.mubr.bf16.mxu1 %v831_v44 }
 0x2cd   :  { %1167 = vmatmul.mubr.bf16.gmra.mrb[40].mxu1 %v832_v47 }
 0x2ce   :  { %1170 = vmatprep.mubr.bf16.mxu1 %v833_v50 }
 0x2d5   :  { %1171 = vmatmul.mubr.bf16.gmra.mrb[44].mxu1 %v834_v51 }
 0x390   :  { %v1160_v52 = vpop.f32.mrb[32].mxu1 }
 0x391   :  { %v877_v54 = vpop.f32.mrb[33].mxu1  ;;  %958 = vst [vmem:[#allocation9 + $0x10] sm:$0xff] %v1160_v52 }
 0x392   :  { %v1161_v55 = vpop.f32.mrb[34].mxu1  ;;  %956 = vst [vmem:[#allocation9] sm:$0xff] %v877_v54 }
 0x393   :  { %v880_v56 = vpop.f32.mrb[35].mxu1  ;;  %959 = vst [vmem:[#allocation9 + $0x18] sm:$0xff] %v1161_v55 }
 0x394   :  { %957 = vst [vmem:[#allocation9 + $0x8] sm:$0xff] %v880_v56 }
 0x398   :  { %v1164_v58 = vpop.f32.mrb[36].mxu1 }
 0x399   :  { %v893_v60 = vpop.f32.mrb[37].mxu1  ;;  %962 = vst [vmem:[#allocation9 + $0x30] sm:$0xff] %v1164_v58 }
 0x39a   :  { %v1165_v53 = vpop.f32.mrb[38].mxu1  ;;  %960 = vst [vmem:[#allocation9 + $0x20] sm:$0xff] %v893_v60 }
 0x39b   :  { %v896_v57 = vpop.f32.mrb[39].mxu1  ;;  %963 = vst [vmem:[#allocation9 + $0x38] sm:$0xff] %v1165_v53 }
 0x39c   :  { %961 = vst [vmem:[#allocation9 + $0x28] sm:$0xff] %v896_v57 }
 0x3a0   :  { %v1168_v59 = vpop.f32.mrb[40].mxu1 }
 0x3a1   :  { %v909_v61 = vpop.f32.mrb[41].mxu1  ;;  %966 = vst [vmem:[#allocation9 + $0x50] sm:$0xff] %v1168_v59 }
 0x3a2   :  { %v1169_v62 = vpop.f32.mrb[42].mxu1  ;;  %964 = vst [vmem:[#allocation9 + $0x40] sm:$0xff] %v909_v61 }
 0x3a3   :  { %v912_v63 = vpop.f32.mrb[43].mxu1  ;;  %967 = vst [vmem:[#allocation9 + $0x58] sm:$0xff] %v1169_v62 }
 0x3a4   :  { %965 = vst [vmem:[#allocation9 + $0x48] sm:$0xff] %v912_v63 }
 0x3a8   :  { %v1172_v0 = vpop.f32.mrb[44].mxu1 }
 0x3a9   :  { %v925_v1 = vpop.f32.mrb[45].mxu1  ;;  %970 = vst [vmem:[#allocation9 + $0x70] sm:$0xff] %v1172_v0 }
 0x3aa   :  { %v1173_v2 = vpop.f32.mrb[46].mxu1  ;;  %968 = vst [vmem:[#allocation9 + $0x60] sm:$0xff] %v925_v1 }
 0x3ab   :  { %v928_v3 = vpop.f32.mrb[47].mxu1  ;;  %971 = vst [vmem:[#allocation9 + $0x78] sm:$0xff] %v1173_v2 }
 0x3ac   :  { %969 = vst [vmem:[#allocation9 + $0x68] sm:$0xff] %v928_v3 }
 0x3ad   :  { %1345 = shalt.err (!%p1342_p0)
}
 0x3ae   :  { %s1346_s27 = scalar_lea.hbm %s1504_s3, 2048 }
 0x3af   :  { %p1347_p1 = scmp.ne.s32.totalorder %s1504_s3, %s1346_s27  ;;  %p1350_p2 = scmp.lt.u32.totalorder %s1346_s27, %s1504_s3 }
 0x3b1   :  { %p1352_p3 = pnand %p1350_p2, %p1347_p1 }
 0x3b3   :  { %1355 = shalt.err (!%p1352_p3)
}
 0x3b4   :  { %s1371_s5 = smov 128   ;;  %s1372_s6 = smov 8  }
 0x3b5   :  { %983 = dma.vmem_to_hbm [thread:$0]  %s978_s23, 2048, %s1504_s3, [#allocation5], %s1371_s5, %s1371_s5, %s1372_s6  }
 0x3b6   :  { %1360 = dma.done.wait [#allocation5], 2048  }
 0x3b7   :  { %1361 = vsyncadd [#allocation5], 4294965248 }
 0x3b8   :  { %987 = vsyncpa [#allocation4], 1 }
 0x3b9   :  { %988 = vsyncpa [#allocation7], 1 }
 0x3ba   :  { %989 = vsyncpa [#allocation5], 1 }

</bundles_post_ra>
